<compile_context>
chip_gen: v6e
topology: v6e:2x2x1
jax: 0.10.0
libtpu: 0.0.40
codegen_flags: <defaults>
</compile_context>

<pallas_src>
import math

import jax
import jax.numpy as jnp
from jax.experimental import pallas as pl
from jax.experimental.pallas import tpu as pltpu


def _round_up(x, m):
    return (x + m - 1) // m * m


def _cdiv(a, b):
    return (a + b - 1) // b


def _align_dim(d, prefer_256):
    """Lane-dense padding: multiple of 128; bump to 256 on 256x256-MXU chips only
    when the dim already exceeds 128 (avoids inflating tiny dims for no gain)."""
    dp = _round_up(max(int(d), 1), 128)
    if prefer_256 and dp > 128:
        dp = _round_up(dp, 256)
    return dp


def _tpu_caps():
    """Returns (prefer_256_alignment, has_two_tensorcores, usable_vmem_bytes)."""
    kind = ""
    try:
        kind = jax.devices()[0].device_kind.lower()
    except Exception:
        pass
    old_gen = any(t in kind for t in ("v2", "v3", "v4", "v5"))   # 128x128 MXU gens
    prefer_256 = not old_gen                                     # v6e / v7x / newer
    multi_tc = any(t in kind for t in ("v4", "v5p", "v7"))       # megacore / 2 TCs
    try:
        vmem_phys = int(pltpu.get_tpu_info().vmem_capacity_bytes)
    except Exception:
        vmem_phys = (128 << 20) if any(t in kind for t in ("v5", "v6")) else (64 << 20)
    # ~54 MiB on a 64 MiB chip (v7x), ~108 MiB on a 128 MiB chip (v5e/v6e)
    usable = max(16 << 20, min(vmem_phys - (8 << 20), int(0.85 * vmem_phys)))
    return prefer_256, multi_tc, usable


def make_feed_forward_network(w1, b1, w2, b2, *, tile_m=1024, tile_f=2048,
                              mxu_dtype=jnp.bfloat16,
                              resident_weight_budget=16 << 20,
                              approximate_gelu=False):
    """Build a reusable FFN:  y = gelu(x @ w1.T + b1) @ w2.T + b2  (dropout = eval id).

    w1: (F, H), b1: (F,), w2: (H, F), b2: (H,)   -- PyTorch nn.Linear layout.
    Returns apply(x) with x of shape (B, S, H).
    """
    F, H = w1.shape
    assert w2.shape == (H, F) and b1.shape == (F,) and b2.shape == (H,)

    prefer_256, multi_tc, vmem_usable = _tpu_caps()
    in_b = jnp.dtype(mxu_dtype).itemsize

    Hp = _align_dim(H, prefer_256)

    # --- F tiling: keep the whole filter dim resident when the weight slabs are small.
    Fp_min = _align_dim(F, prefer_256)
    if 2 * Hp * Fp_min * in_b <= resident_weight_budget:
        tf = Fp_min                                   # weights DMA'd exactly once
    else:
        tf = _align_dim(min(tile_f, Fp_min), prefer_256)
    Fp = _round_up(F, tf)
    n_f = Fp // tf
    weights_resident = (n_f == 1)

    # --- Weight prep hoisted out of the per-call path (transpose / pad / cast once).
    w1_t = jnp.pad(jnp.asarray(w1).T, ((0, Hp - H), (0, Fp - F))).astype(mxu_dtype)   # (Hp, Fp)
    w2_t = jnp.pad(jnp.asarray(w2).T, ((0, Fp - F), (0, Hp - H))).astype(mxu_dtype)   # (Fp, Hp)
    b1_2d = jnp.pad(jnp.asarray(b1), (0, Fp - F)).astype(jnp.float32).reshape(1, Fp)
    b2_2d = jnp.pad(jnp.asarray(b2), (0, Hp - H)).astype(jnp.float32).reshape(1, Hp)

    def apply(x):
        B, S, H_in = x.shape
        assert H_in == H, f"expected hidden={H}, got {H_in}"
        out_dtype = x.dtype
        out_b = jnp.dtype(out_dtype).itemsize
        # f32 outputs accumulate directly into the resident output block.
        use_acc_scratch = (out_dtype != jnp.float32)
        M = B * S

        # --- pick the M tile ---------------------------------------------------
        tm = min(tile_m, _round_up(M, 8))
        if multi_tc and M > 8 and _cdiv(M, tm) < 2:
            tm = _round_up(_cdiv(M, 2), 8)            # give both TensorCores a tile

        def vmem_need(tm_):
            n = 2 * (tm_ * Hp * in_b                  # x tile (double-buffered)
                     + Hp * tf * in_b                 # W1 slab
                     + tf * Hp * in_b                 # W2 slab
                     + tf * 4 + Hp * 4                # biases
                     + tm_ * Hp * out_b)              # output tile
            n += tm_ * tf * (4 + in_b)                # dot-1 f32 result + bf16 cast
            if use_acc_scratch:
                n += tm_ * Hp * 4                     # f32 accumulator scratch
            return n

        while vmem_need(tm) + (4 << 20) > vmem_usable and tm > 8:
            tm = max(8, _round_up(tm // 2, 8))        # shrink until it fits the budget

        Mp = _round_up(M, tm)
        grid = (Mp // tm, n_f)
        vmem_limit = int(min(max(vmem_need(tm) + (4 << 20), 16 << 20), vmem_usable))

        # --- kernel -------------------------------------------------------------
        def kernel(x_ref, w1_ref, b1_ref, w2_ref, b2_ref, o_ref, *scratch):
            acc = scratch[0] if use_acc_scratch else o_ref
            f = pl.program_id(1)

            @pl.when(f == 0)
            def _init():
                # fold the second bias into the accumulator init
                acc[...] = jnp.broadcast_to(b2_ref[...], acc.shape)

            # layer1 slice: x @ W1[:, f_tile] (bf16 operands, f32 accumulation) + b1
            h = jnp.dot(x_ref[...], w1_ref[...],
                        preferred_element_type=jnp.float32) + b1_ref[...]

            if approximate_gelu:
                # tanh GELU -> EUP (frees the VALU slot); ~1e-3 delta vs exact erf
                h = jax.nn.gelu(h, approximate=True)
            else:
                # exact erf-based GELU in f32 (matches torch.nn.GELU() default)
                h = 0.5 * h * (1.0 + jax.lax.erf(h * (1.0 / math.sqrt(2.0))))

            # dropout: identity (eval-mode semantics)
            # TODO(synk): training-mode dropout (Bernoulli mask + 1/(1-p) scale) omitted.

            # layer2 partial: accumulate gelu(...) @ W2[f_tile, :]
            acc[...] += jnp.dot(h.astype(w2_ref.dtype), w2_ref[...],
                                preferred_element_type=jnp.float32)

            if use_acc_scratch:
                @pl.when(f == pl.num_programs(1) - 1)
                def _finalize():
                    o_ref[...] = acc[...].astype(o_ref.dtype)

        scratch_shapes = [pltpu.VMEM((tm, Hp), jnp.float32)] if use_acc_scratch else []

        # Lane-dense padding of the activations (per call; weights already padded).
        x2 = jnp.pad(x.reshape(M, H), ((0, Mp - M), (0, Hp - H))).astype(mxu_dtype)

        weight_passes = 1 if weights_resident else (Mp // tm)
        cost = pl.CostEstimate(
            flops=4 * Mp * Hp * Fp,                   # two matmuls, 2 flops per MAC
            transcendentals=Mp * Fp,                  # one erf/tanh per GELU element
            bytes_accessed=(Mp * Hp * in_b            # x
                            + weight_passes * 2 * Hp * Fp * in_b   # streamed weights
                            + Fp * 4 + Hp * 4                      # biases
                            + Mp * Hp * out_b),                    # output
        )

        out = pl.pallas_call(
            kernel,
            out_shape=jax.ShapeDtypeStruct((Mp, Hp), out_dtype),
            grid_spec=pltpu.PrefetchScalarGridSpec(
                num_scalar_prefetch=0,
                grid=grid,
                in_specs=[
                    pl.BlockSpec((tm, Hp), lambda i, f: (i, 0)),   # x tile (const over f)
                    pl.BlockSpec((Hp, tf), lambda i, f: (0, f)),   # W1 column slab
                    pl.BlockSpec((1, tf), lambda i, f: (0, f)),    # b1 slice
                    pl.BlockSpec((tf, Hp), lambda i, f: (f, 0)),   # W2 row slab
                    pl.BlockSpec((1, Hp), lambda i, f: (0, 0)),    # b2 (resident)
                ],
                out_specs=pl.BlockSpec((tm, Hp), lambda i, f: (i, 0)),
                scratch_shapes=scratch_shapes,
            ),
            compiler_params=pltpu.CompilerParams(
                dimension_semantics=("parallel", "arbitrary"),
                vmem_limit_bytes=vmem_limit,
            ),
            cost_estimate=cost,
        )(x2, w1_t, b1_2d, w2_t, b2_2d)

        return out[:M, :H].reshape(B, S, H)

    return apply


def feed_forward_network(x, w1, b1, w2, b2, **kwargs):
    """One-shot convenience wrapper (prefer make_feed_forward_network for reuse)."""
    return make_feed_forward_network(w1, b1, w2, b2, **kwargs)(x)


def _xavier_uniform(key, shape, dtype=jnp.float32):
    # shape = (fan_out, fan_in) to match torch.nn.Linear.weight
    fan_out, fan_in = shape
    bound = math.sqrt(6.0 / (fan_in + fan_out))
    return jax.random.uniform(key, shape, dtype, minval=-bound, maxval=bound)


def _reference_ffn(x, w1, b1, w2, b2, mxu_dtype=None):
    """Pure-JAX reference.  If mxu_dtype is set, mimics the kernel's mixed precision."""
    if mxu_dtype is not None:
        xm, w1m, w2m = x.astype(mxu_dtype), w1.astype(mxu_dtype), w2.astype(mxu_dtype)
    else:
        xm, w1m, w2m = x, w1, w2
    h = jnp.einsum("bsh,fh->bsf", xm, w1m, preferred_element_type=jnp.float32) + b1
    h = 0.5 * h * (1.0 + jax.lax.erf(h / math.sqrt(2.0)))
    if mxu_dtype is not None:
        h = h.astype(mxu_dtype)
    return jnp.einsum("bsf,hf->bsh", h, w2m, preferred_element_type=jnp.float32) + b2


if __name__ == "__main__":
    batch, seq, hidden, filt = 2, 8, 32, 128

    key = jax.random.PRNGKey(0)
    kx, kw1, kw2 = jax.random.split(key, 3)

    x = jax.random.normal(kx, (batch, seq, hidden), jnp.float32)

    # deterministic xavier-uniform weights, zero biases (matches initialize_weight)
    w1 = _xavier_uniform(kw1, (filt, hidden))   # layer1.weight : (filter, hidden)
    b1 = jnp.zeros((filt,), jnp.float32)        # layer1.bias
    w2 = _xavier_uniform(kw2, (hidden, filt))   # layer2.weight : (hidden, filter)
    b2 = jnp.zeros((hidden,), jnp.float32)      # layer2.bias

    ffn = make_feed_forward_network(w1, b1, w2, b2)   # weights prepared once

    # f32 input -> accumulate directly in the resident output block (no scratch)
    y = jax.block_until_ready(ffn(x))
    assert y.shape == (batch, seq, hidden) and y.dtype == jnp.float32

    # tight check vs a reference using the same bf16-operand / f32-accumulate recipe
    y_ref_bf16 = _reference_ffn(x, w1, b1, w2, b2, mxu_dtype=jnp.bfloat16)
    assert jnp.allclose(y, y_ref_bf16, atol=2e-3, rtol=2e-3), "mismatch vs bf16 reference"

    # sanity check vs the pure-f32 reference (bf16 MXU operands => looser tolerance)
    y_ref_f32 = _reference_ffn(x, w1, b1, w2, b2, mxu_dtype=None)
    assert jnp.allclose(y, y_ref_f32, atol=5e-2, rtol=5e-2), "mismatch vs f32 reference"

    # bf16 input -> exercises the f32 scratch-accumulator / cast-on-store path
    y_bf16 = jax.block_until_ready(ffn(x.astype(jnp.bfloat16)))
    assert y_bf16.shape == (batch, seq, hidden) and y_bf16.dtype == jnp.bfloat16
    assert jnp.allclose(y_bf16.astype(jnp.float32), y_ref_f32, atol=8e-2, rtol=8e-2), \
        "mismatch on bf16-output path"

    print("KERNEL_OK")
</pallas_src>

<mosaic_0001>
module attributes {stable_mosaic.version = 11 : i64} {
  func.func @kernel(%arg0: i32, %arg1: i32, %arg2: memref<16x128xbf16, #tpu.memory_space<vmem>>, %arg3: memref<128x128xbf16, #tpu.memory_space<vmem>>, %arg4: memref<1x128xf32, #tpu.memory_space<vmem>>, %arg5: memref<128x128xbf16, #tpu.memory_space<vmem>>, %arg6: memref<1x128xf32, #tpu.memory_space<vmem>>, %arg7: memref<16x128xf32, #tpu.memory_space<vmem>>) attributes {dimension_semantics = [#tpu.dimension_semantics<parallel>, #tpu.dimension_semantics<arbitrary>], iteration_bounds = array<i64: 1, 1>, scalar_prefetch = 0 : i64, scratch_operands = 0 : i64, tpu.core_type = #tpu.core_type<tc>, window_params = [{transform_indices = @transform_0, window_bounds = array<i64: 16, 128>}, {transform_indices = @transform_1, window_bounds = array<i64: 128, 128>}, {transform_indices = @transform_2, window_bounds = array<i64: 1, 128>}, {transform_indices = @transform_3, window_bounds = array<i64: 128, 128>}, {pipeline_mode = #tpu.pipeline_mode<synchronous>, transform_indices = @transform_4, window_bounds = array<i64: 1, 128>}, {transform_indices = @transform_5, window_bounds = array<i64: 16, 128>}]} {
    %c0_i32 = arith.constant 0 : i32
    %0 = arith.cmpi eq, %arg1, %c0_i32 : i32
    %1 = arith.extui %0 : i1 to i32
    %c0_i32_0 = arith.constant 0 : i32
    %2 = arith.cmpi ne, %1, %c0_i32_0 : i32
    scf.if %2 {
      %c0_16 = arith.constant 0 : index
      %c0_17 = arith.constant 0 : index
      %23 = vector.load %arg6[%c0_16, %c0_17] : memref<1x128xf32, #tpu.memory_space<vmem>>, vector<1x128xf32>
      %24 = vector.shape_cast %23 : vector<1x128xf32> to vector<1x128xf32>
      %25 = vector.broadcast %24 : vector<1x128xf32> to vector<16x128xf32>
      %c0_18 = arith.constant 0 : index
      %c0_19 = arith.constant 0 : index
      %26 = vector.load %arg7[%c0_18, %c0_19] : memref<16x128xf32, #tpu.memory_space<vmem>>, vector<16x128xf32>
      tpu.vector_store %arg7[%c0_18, %c0_19], %25 {strides = array<i32>} : memref<16x128xf32, #tpu.memory_space<vmem>>, vector<16x128xf32>,
    } else {
    }
    %c0 = arith.constant 0 : index
    %c0_1 = arith.constant 0 : index
    %3 = vector.load %arg2[%c0, %c0_1] : memref<16x128xbf16, #tpu.memory_space<vmem>>, vector<16x128xbf16>
    %c0_2 = arith.constant 0 : index
    %c0_3 = arith.constant 0 : index
    %4 = vector.load %arg3[%c0_2, %c0_3] : memref<128x128xbf16, #tpu.memory_space<vmem>>, vector<128x128xbf16>
    %cst = arith.constant dense<0.000000e+00> : vector<16x128xf32>
    %5 = tpu.matmul %3, %4, %cst {dimension_numbers = #tpu.dot_dimension_numbers<[1], [0], [0], [1], [0, 0, 1, 1], [], []>} : vector<16x128xbf16>, vector<128x128xbf16>, vector<16x128xf32> -> vector<16x128xf32>
    %c0_4 = arith.constant 0 : index
    %c0_5 = arith.constant 0 : index
    %6 = vector.load %arg4[%c0_4, %c0_5] : memref<1x128xf32, #tpu.memory_space<vmem>>, vector<1x128xf32>
    %7 = vector.broadcast %6 : vector<1x128xf32> to vector<16x128xf32>
    %8 = arith.addf %5, %7 : vector<16x128xf32>
    %cst_6 = arith.constant 5.000000e-01 : f32
    %9 = vector.broadcast %cst_6 : f32 to vector<16x128xf32>
    %10 = arith.mulf %9, %8 : vector<16x128xf32>
    %cst_7 = arith.constant 0.707106769 : f32
    %11 = vector.broadcast %cst_7 : f32 to vector<16x128xf32>
    %12 = arith.mulf %8, %11 : vector<16x128xf32>
    %13 = math.erf %12 : vector<16x128xf32>
    %cst_8 = arith.constant 1.000000e+00 : f32
    %14 = vector.broadcast %cst_8 : f32 to vector<16x128xf32>
    %15 = arith.addf %14, %13 : vector<16x128xf32>
    %16 = arith.mulf %10, %15 : vector<16x128xf32>
    %c0_9 = arith.constant 0 : index
    %c0_10 = arith.constant 0 : index
    %17 = vector.load %arg7[%c0_9, %c0_10] : memref<16x128xf32, #tpu.memory_space<vmem>>, vector<16x128xf32>
    %18 = arith.truncf %16 : vector<16x128xf32> to vector<16x128xbf16>
    %c0_11 = arith.constant 0 : index
    %c0_12 = arith.constant 0 : index
    %19 = vector.load %arg5[%c0_11, %c0_12] : memref<128x128xbf16, #tpu.memory_space<vmem>>, vector<128x128xbf16>
    %cst_13 = arith.constant dense<0.000000e+00> : vector<16x128xf32>
    %20 = tpu.matmul %18, %19, %cst_13 {dimension_numbers = #tpu.dot_dimension_numbers<[1], [0], [0], [1], [0, 0, 1, 1], [], []>} : vector<16x128xbf16>, vector<128x128xbf16>, vector<16x128xf32> -> vector<16x128xf32>
    %21 = arith.addf %17, %20 : vector<16x128xf32>
    %c0_14 = arith.constant 0 : index
    %c0_15 = arith.constant 0 : index
    %22 = vector.load %arg7[%c0_14, %c0_15] : memref<16x128xf32, #tpu.memory_space<vmem>>, vector<16x128xf32>
    tpu.vector_store %arg7[%c0_14, %c0_15], %21 {strides = array<i32>} : memref<16x128xf32, #tpu.memory_space<vmem>>, vector<16x128xf32>,
    return
  }
  func.func @transform_0(%arg0: i32, %arg1: i32) -> (i32, i32) {
    %c0_i32 = arith.constant 0 : i32
    %c0_i32_0 = arith.constant 0 : i32
    return %arg0, %c0_i32 : i32, i32
  }
  func.func @transform_1(%arg0: i32, %arg1: i32) -> (i32, i32) {
    %c0_i32 = arith.constant 0 : i32
    %c0_i32_0 = arith.constant 0 : i32
    return %c0_i32, %arg1 : i32, i32
  }
  func.func @transform_2(%arg0: i32, %arg1: i32) -> (i32, i32) {
    %c0_i32 = arith.constant 0 : i32
    %c0_i32_0 = arith.constant 0 : i32
    return %c0_i32, %arg1 : i32, i32
  }
  func.func @transform_3(%arg0: i32, %arg1: i32) -> (i32, i32) {
    %c0_i32 = arith.constant 0 : i32
    %c0_i32_0 = arith.constant 0 : i32
    return %arg1, %c0_i32 : i32, i32
  }
  func.func @transform_4(%arg0: i32, %arg1: i32) -> (i32, i32) {
    %c0_i32 = arith.constant 0 : i32
    %c0_i32_0 = arith.constant 0 : i32
    %c0_i32_1 = arith.constant 0 : i32
    return %c0_i32, %c0_i32_0 : i32, i32
  }
  func.func @transform_5(%arg0: i32, %arg1: i32) -> (i32, i32) {
    %c0_i32 = arith.constant 0 : i32
    %c0_i32_0 = arith.constant 0 : i32
    return %arg0, %c0_i32 : i32, i32
  }
}

</mosaic_0001>

<bundles_post_ra>
// kernel: tpu_custom_call.1
= control target key start
LH: loop header
LB: loop body
LE: loop exit
PB: predicated region body
PF: predicated region fallthrough
CT: control target
= control target key end

     0   :  { %10 = vsyncpa [#allocation3], 0  ;;  %s588_s0 = inlined_call_operand.hbm [shape: bf16[16,128], index: 0, kind: input, shape index: {}]   ;;  %s589_s1 = inlined_call_operand.hbm [shape: bf16[128,128], index: 1, kind: input, shape index: {}]   ;;  %s590_s2 = inlined_call_operand.vmem [shape: f32[1,128], index: 2, kind: input, shape index: {}]   ;;  %s591_s3 = inlined_call_operand.hbm [shape: bf16[128,128], index: 3, kind: input, shape index: {}]   ;;  %s592_s4 = inlined_call_operand.vmem [shape: f32[1,128], index: 4, kind: input, shape index: {}]   ;;  %s593_s5 = inlined_call_operand.hbm [shape: f32[16,128], index: 5, kind: output, shape index: {}]  }
   0x1   :  { %11 = vsyncpa [#allocation6], 0 }
   0x2   :  { %12 = vsyncpa [#allocation4], 0  ;;  %s530_s18 = smov [#allocation5]   ;;  %s531_s20 = smov [#allocation2]  }
   0x3   :  { %s30_s19 = sshll.u32 %s530_s18, 4  ;;  %s18_s21 = sshll.u32 %s531_s20, 4  ;;  %s31_s19 = int_to_ptr.vmem [resolvable:$true] %s30_s19  ;;  %s19_s21 = int_to_ptr.vmem [resolvable:$true] %s18_s21 }
   0x4   :  { %s452_s22 = scalar_lea.vmem %s31_s19, 1024  ;;  %p457_p1 = scmp.lt.s32.totalorder %s31_s19, %s31_s19 }
   0x5   :  { %p453_p0 = scmp.ne.s32.totalorder %s31_s19, %s452_s22  ;;  %p458_p2 = scmp.lt.s32.totalorder %s452_s22, %s452_s22 }
   0x7   :  { %p459_p3 = por %p458_p2, %p457_p1 }
   0x9   :  { %p460_p4 = pnand %p459_p3, %p453_p0 }
   0xb   :  { %463 = shalt.err (!%p460_p4)
}
   0xc   :  { %s532_s23 = smov 64   ;;  %s533_s24 = smov 4  }
   0xd   :  { %36 = dma.hbm_to_vmem [thread:$0]  %s589_s1, 1024, %s31_s19, [#allocation6], %s532_s23, %s532_s23, %s533_s24  }
   0xe   :  { %s472_s27 = scalar_lea.vmem %s19_s21, 128  ;;  %p477_p6 = scmp.lt.s32.totalorder %s19_s21, %s19_s21 }
   0xf   :  { %p473_p5 = scmp.ne.s32.totalorder %s19_s21, %s472_s27  ;;  %p478_p7 = scmp.lt.s32.totalorder %s472_s27, %s472_s27 }
  0x11   :  { %p479_p8 = por %p478_p7, %p477_p6 }
  0x13   :  { %p480_p9 = pnand %p479_p8, %p473_p5 }
  0x15   :  { %483 = shalt.err (!%p480_p9)
}
  0x16   :  { %24 = dma.hbm_to_vmem [thread:$0]  %s588_s0, 128, %s19_s21, [#allocation3], %s532_s23, %s532_s23, %s533_s24  }
  0x17   :  { %s534_s30 = smov [#allocation7]  }
  0x18   :  { %s44_s6 = sshll.u32 %s534_s30, 4  ;;  %s45_s6 = int_to_ptr.vmem [resolvable:$true] %s44_s6 }
  0x19   :  { %s492_s7 = scalar_lea.vmem %s45_s6, 1024  ;;  %p497_p11 = scmp.lt.s32.totalorder %s45_s6, %s45_s6 }
  0x1a   :  { %p493_p10 = scmp.ne.s32.totalorder %s45_s6, %s492_s7  ;;  %p498_p12 = scmp.lt.s32.totalorder %s492_s7, %s492_s7 }
  0x1c   :  { %p499_p13 = por %p498_p12, %p497_p11 }
  0x1e   :  { %p500_p0 = pnand %p499_p13, %p493_p10 }
  0x20   :  { %503 = shalt.err (!%p500_p0)
}
  0x21   :  { %50 = dma.hbm_to_vmem [thread:$0]  %s591_s3, 1024, %s45_s6, [#allocation6], %s532_s23, %s532_s23, %s533_s24  }
  0x22   :  { %524 = dma.done.wait [#allocation3], 128  }
  0x23   :  { %525 = vsyncadd [#allocation3], 4294967168 }
  0x24   :  { %526 = dma.done.wait [#allocation6], 2048  }
  0x25   :  { %527 = vsyncadd [#allocation6], 4294965248  ;;  %v535_v0 = vmov 0.0   ;;  %vm536_vm0 = vmmov 0   ;;  %v423_v1 = vld [vmem:[#allocation5 + $0x38] sm:$0xff]   ;;  %v424_v2 = vld [vmem:[#allocation5 + $0x30] sm:$0xff]  }
  0x26   :  { %373 = vmatprep.subr.bf16.mxu0 %v535_v0  ;;  %389 = vmatprep.mubr.msk.bf16.mxu0 %vm536_vm0, %v535_v0  ;;  %v425_v3 = vld [vmem:[#allocation5 + $0x28] sm:$0xff]   ;;  %v432_v4 = vld [vmem:[#allocation7 + $0x38] sm:$0xff]   ;;  %v426_v5 = vld [vmem:[#allocation5 + $0x20] sm:$0xff]   ;;  %s537_s10 = smov [#allocation8]  }
  0x27   :  { %393 = vmatprep.subr.bf16.mxu1 %v535_v0  ;;  %409 = vmatprep.mubr.msk.bf16.mxu1 %vm536_vm0, %v535_v0  ;;  %v427_v6 = vld [vmem:[#allocation5 + $0x18] sm:$0xff]   ;;  %v428_v7 = vld [vmem:[#allocation5 + $0x10] sm:$0xff]   ;;  %v429_v8 = vld [vmem:[#allocation5 + $0x8] sm:$0xff]   ;;  %s323_s11 = sshll.u32 %s537_s10, 4  ;;  %s324_s11 = int_to_ptr.vmem [resolvable:$true] %s323_s11 }
  0x28   :  { %374 = vmatpush3.bf16.msra.mxu0 %v423_v1  ;;  %394 = vmatpush3.bf16.msra.mxu1 %v432_v4  ;;  %v430_v9 = vld [vmem:[#allocation5] sm:$0xff]   ;;  %v431_v10 = vld [vmem:[#allocation2] sm:$0xff]   ;;  %v433_v11 = vld [vmem:[#allocation7 + $0x30] sm:$0xff]   ;;  %s504_s12 = scalar_lea.vmem %s324_s11, 256  ;;  %p509_p2 = scmp.lt.s32.totalorder %s324_s11, %s324_s11 }
  0x29   :  { %375 = vmatprep.subr.bf16.mxu0 %v535_v0  ;;  %395 = vmatprep.subr.bf16.mxu1 %v535_v0  ;;  %v434_v12 = vld [vmem:[#allocation7 + $0x28] sm:$0xff]   ;;  %v435_v13 = vld [vmem:[#allocation7 + $0x20] sm:$0xff]   ;;  %v436_v14 = vld [vmem:[#allocation7 + $0x18] sm:$0xff]   ;;  %p505_p1 = scmp.ne.s32.totalorder %s324_s11, %s504_s12  ;;  %p510_p3 = scmp.lt.s32.totalorder %s504_s12, %s504_s12 }
  0x2a   :  { %v437_v15 = vld [vmem:[#allocation7 + $0x10] sm:$0xff]   ;;  %v438_v16 = vld [vmem:[#allocation7 + $0x8] sm:$0xff]   ;;  %v439_v17 = vld [vmem:[#allocation7] sm:$0xff]  }
  0x2b   :  { %v337_v18 = vld [vmem:[%s590_s2] ss:$0 sm:$0xff]  ;;  %p511_p4 = por %p510_p3, %p509_p2 }
  0x2c   :  { %376 = vmatpush3.bf16.msra.mxu0 %v424_v2  ;;  %396 = vmatpush3.bf16.msra.mxu1 %v433_v11  ;;  %v336_v36 = vld [vmem:[%s592_s4] ss:$0 sm:$0xff] }
  0x2d   :  { %377 = vmatprep.subr.bf16.mxu0 %v535_v0  ;;  %397 = vmatprep.subr.bf16.mxu1 %v535_v0  ;;  %p512_p5 = pnand %p511_p4, %p505_p1 }
  0x30   :  { %378 = vmatpush3.bf16.msra.mxu0 %v425_v3  ;;  %398 = vmatpush3.bf16.msra.mxu1 %v434_v12 }
  0x31   :  { %379 = vmatprep.subr.bf16.mxu0 %v535_v0  ;;  %399 = vmatprep.subr.bf16.mxu1 %v535_v0 }
  0x34   :  { %380 = vmatpush3.bf16.msra.mxu0 %v426_v5  ;;  %400 = vmatpush3.bf16.msra.mxu1 %v435_v13 }
  0x35   :  { %381 = vmatprep.subr.bf16.mxu0 %v535_v0  ;;  %401 = vmatprep.subr.bf16.mxu1 %v535_v0 }
  0x38   :  { %382 = vmatpush3.bf16.msra.mxu0 %v427_v6  ;;  %402 = vmatpush3.bf16.msra.mxu1 %v436_v14 }
  0x39   :  { %383 = vmatprep.subr.bf16.mxu0 %v535_v0  ;;  %403 = vmatprep.subr.bf16.mxu1 %v535_v0 }
  0x3c   :  { %384 = vmatpush3.bf16.msra.mxu0 %v428_v7  ;;  %404 = vmatpush3.bf16.msra.mxu1 %v437_v15 }
  0x3d   :  { %385 = vmatprep.subr.bf16.mxu0 %v535_v0  ;;  %405 = vmatprep.subr.bf16.mxu1 %v535_v0 }
  0x40   :  { %386 = vmatpush3.bf16.msra.mxu0 %v429_v8  ;;  %406 = vmatpush3.bf16.msra.mxu1 %v438_v16 }
  0x41   :  { %387 = vmatprep.subr.bf16.mxu0 %v535_v0  ;;  %407 = vmatprep.subr.bf16.mxu1 %v535_v0 }
  0x44   :  { %388 = vmatpush3.bf16.msra.mxu0 %v430_v9  ;;  %408 = vmatpush3.bf16.msra.mxu1 %v439_v17 }
  0x47   :  { %390 = vmatmul.mubr.bf16.vlgmr.msra.gmra.mxu0 %v431_v10 }
 0x107   :  { %v189_v19 = vpop.f32.mrf.mxu0 }
 0x108   :  { %v190_v20 = vadd.f32 %v337_v18, %v189_v19 }
 0x109   :  { %v391_v21 = vpop.f32.mrf.mxu0 }
 0x10a   :  { %v198_v22 = vmul.f32 0.70710677, %v190_v20  ;;  %v196_v30 = vmul.f32 0.5, %v190_v20 }
 0x10b   :  { %v192_v23 = vpop.f32.mrf.mxu0 }
 0x10c   :  { %440 = verf.f32 %v198_v22  ;;  %v193_v24 = vadd.f32 %v337_v18, %v192_v23 }
 0x10d   :  { %v392_v25 = vpop.f32.mrf.mxu0 }
 0x10e   :  { %v199_v26 = vmul.f32 0.70710677, %v193_v24  ;;  %v197_v31 = vmul.f32 0.5, %v193_v24 }
 0x110   :  { %442 = verf.f32 %v199_v26 }
 0x119   :  { %v441_v27 = vpop.eup %440 }
 0x11a   :  { %v202_v28 = vadd.f32 1.0, %v441_v27 }
 0x11c   :  { %v204_v33 = vmul.f32 %v202_v28, %v196_v30 }
 0x11d   :  { %v443_v29 = vpop.eup %442 }
 0x11e   :  { %v203_v32 = vadd.f32 1.0, %v443_v29 }
 0x120   :  { %v205_v34 = vmul.f32 %v203_v32, %v197_v31 }
 0x122   :  { %v208_v35 = vpack.c.bf16 %v205_v34, %v204_v33 }
 0x124   :  { %410 = vmatmul.mubr.bf16.vlgmr.msra.gmra.mxu1 %v208_v35 }
 0x1e4   :  { %v307_v37 = vpop.f32.mrf.mxu1 }
 0x1e5   :  { %v314_v38 = vadd.f32 %v336_v36, %v307_v37 }
 0x1e6   :  { %v411_v39 = vpop.f32.mrf.mxu1 }
 0x1e7   :  { %316 = vst [vmem:[#allocation8] sm:$0xff] %v314_v38 }
 0x1e8   :  { %v310_v40 = vpop.f32.mrf.mxu1 }
 0x1e9   :  { %v315_v41 = vadd.f32 %v336_v36, %v310_v40 }
 0x1ea   :  { %v412_v42 = vpop.f32.mrf.mxu1 }
 0x1eb   :  { %317 = vst [vmem:[#allocation8 + $0x8] sm:$0xff] %v315_v41 }
 0x1ec   :  { %515 = shalt.err (!%p512_p5)
}
 0x1ed   :  { %s538_s13 = smov 128   ;;  %s539_s4 = smov 8  }
 0x1ee   :  { %329 = dma.vmem_to_hbm [thread:$0]  %s324_s11, 256, %s593_s5, [#allocation4], %s538_s13, %s538_s13, %s539_s4  }
 0x1ef   :  { %528 = dma.done.wait [#allocation4], 256  }
 0x1f0   :  { %529 = vsyncadd [#allocation4], 4294967040 }
 0x1f1   :  { %333 = vsyncpa [#allocation3], 1 }
 0x1f2   :  { %334 = vsyncpa [#allocation6], 1 }
 0x1f3   :  { %335 = vsyncpa [#allocation4], 1 }

</bundles_post_ra>
